<compile_context>
chip_gen: v7x
topology: tpu7x:2x2x1
jax: 0.10.0
libtpu: 0.0.40
codegen_flags: <defaults>
</compile_context>

<pallas_src>
import jax
import jax.numpy as jnp
from jax import lax
from jax.experimental import pallas as pl
from jax.experimental.pallas import tpu as pltpu


# ---------------------------------------------------------------------------
# Tiling / budget helpers
# ---------------------------------------------------------------------------

_MAX_BLOCK_N = 1024                       # lanes per tile (multiple of 128)
_DEFAULT_PER_TILE_BYTES = 2 * 1024 * 1024  # ~2 MiB/tile: at the HBM roofline already
_MIN_PALLAS_BYTES = 256 * 1024             # below this, let XLA fuse the pow
_LANE_WIDTHS = (1024, 512, 256, 128)       # candidate lane-dense slab widths


def _per_tile_budget_bytes() -> int:
    """Per-tile VMEM budget; 4 live tiles (in+out, double-buffered) total."""
    budget = _DEFAULT_PER_TILE_BYTES
    try:
        info = pltpu.get_tpu_info()
        cap = getattr(info, "vmem_capacity_bytes", None)
        if cap:
            # Keep the 4-tile footprint at <= ~25% of physical VMEM (v7x: 64 MiB).
            budget = min(budget, max(256 * 1024, cap // 16))
    except Exception:
        # Defensive: fall back to the fixed budget (interpret mode / older jax).
        pass
    return budget


def _lane_dense_view(data: jax.Array) -> jax.Array:
    """2D lane-dense view of `data` for elementwise streaming.

    Prefers (rows, L) with L a multiple of 128 (unmasked stores) and rows >= 8
    (fully packed vregs / efficient DMA), independent of the original last dim.
    """
    t = data.size
    # Best case: L divides the total count and gives >= 8 rows.
    for lanes in _LANE_WIDTHS:
        if t % lanes == 0 and t >= 8 * lanes:
            return data.reshape(t // lanes, lanes)
    # Next: L divides the total count (small arrays; still lane-dense).
    for lanes in _LANE_WIDTHS:
        if t % lanes == 0:
            return data.reshape(t // lanes, lanes)
    # Awkward totals (not a multiple of 128): keep the trailing dim as lanes.
    # Boundary blocks are masked by Pallas; results stay correct.
    if data.ndim >= 2:
        return data.reshape(-1, data.shape[-1])
    return data.reshape(1, -1)


def _choose_blocks(m: int, n: int, itemsize: int):
    """Pick a legal (block_m, block_n) under the per-tile VMEM budget."""
    per_tile = _per_tile_budget_bytes()

    # Lane axis: full width when small, otherwise a 128-multiple tile.  With a
    # pl.cdiv grid, a non-divisible N just gets a masked boundary block; the
    # footprint stays bounded for every shape.
    block_n = n if n <= _MAX_BLOCK_N else _MAX_BLOCK_N

    # Row axis: largest multiple of 8 keeping one tile under the budget
    # (full extent allowed for small arrays: no divisibility constraint then).
    max_rows = max(8, per_tile // max(1, block_n * itemsize))
    if max_rows >= m:
        block_m = m
    else:
        block_m = max(8, (max_rows // 8) * 8)

    # Megacore (v7x has 2 TensorCores): guarantee >= 2 grid blocks for
    # non-trivial arrays so both cores stream.  Costs one extra ~0.35us grid
    # step on single-TC chips (v5e/v6e), which is noise.
    grid_blocks = pl.cdiv(m, block_m) * pl.cdiv(n, block_n)
    if grid_blocks == 1 and m >= 16 and m * n * itemsize > (1 << 20):
        half = (m + 1) // 2
        block_m = max(8, ((half + 7) // 8) * 8)   # multiple of 8, < m for m >= 16

    return block_m, block_n


# ---------------------------------------------------------------------------
# Kernel
# ---------------------------------------------------------------------------

def _make_ordered_param_kernel(order: float):
    """Build a kernel with the exponent baked in as a compile-time constant."""
    order = float(order)
    int_order = int(order) if float(int(order)) == order else None

    def kernel(data_ref, out_ref):
        x = data_ref[...]
        if int_order is not None:
            # Strength-reduced to a short VPU multiply chain (exact at x == 0,
            # valid for negative bases too).
            out_ref[...] = lax.integer_pow(x, int_order)
        else:
            # Positive-domain pow: data = real_val**(1/order) is only finite
            # for real_val >= 0 with a non-integer 1/order, so x >= 0 here.
            # exp / log ride the single EUP slot and stay hidden under HBM
            # bandwidth; avoids generic-pow's negative-base select plumbing.
            out_ref[...] = jnp.exp(jnp.asarray(order, x.dtype) * jnp.log(x))

    return kernel


def ordered_param_forward(data: jax.Array, order: float, *,
                          min_pallas_bytes: int = _MIN_PALLAS_BYTES) -> jax.Array:
    """Pallas equivalent of ordered_param.forward(): elementwise data ** order."""
    order = float(order)
    int_order = int(order) if float(int(order)) == order else None

    if data.size == 0:
        return data

    nbytes = data.size * data.dtype.itemsize
    if nbytes < min_pallas_bytes:
        # Parameter-sized tensors: the pallas_call dispatch + custom-call
        # boundary dominates; let XLA fuse the constant-exponent pow instead.
        if int_order is not None:
            return lax.integer_pow(data, int_order)
        return jnp.power(data, jnp.asarray(order, data.dtype))

    orig_shape = data.shape
    data2d = _lane_dense_view(data)
    m, n = data2d.shape
    block_m, block_n = _choose_blocks(m, n, data2d.dtype.itemsize)
    grid = (pl.cdiv(m, block_m), pl.cdiv(n, block_n))

    kernel = _make_ordered_param_kernel(order)
    out2d = pl.pallas_call(
        kernel,
        out_shape=jax.ShapeDtypeStruct((m, n), data2d.dtype),
        grid=grid,
        in_specs=[pl.BlockSpec((block_m, block_n), lambda i, j: (i, j))],
        out_specs=pl.BlockSpec((block_m, block_n), lambda i, j: (i, j)),
        compiler_params=pltpu.CompilerParams(
            dimension_semantics=("parallel", "parallel"),
            # No vmem_limit override needed: ~8 MiB double-buffered footprint
            # stays under every generation's default scoped VMEM (v5e: 16 MiB).
        ),
    )(data2d)
    return out2d.reshape(orig_shape)


# ---------------------------------------------------------------------------
# Module wrapper (parameter setup is plain-JAX glue, as in the PyTorch module)
# ---------------------------------------------------------------------------

class OrderedParam:
    """JAX mirror of the PyTorch `ordered_param` module."""

    def __init__(self, real_val: jax.Array, order: float = 3.0):
        assert order < 0.0 or order > 1.0, (
            "0 may crash the algorithm. 0<order<=1 slows down the training."
        )
        # Mirror of the non-trainable torch Parameter.
        self.order = jnp.array([order], dtype=jnp.float32)
        # Trainable data parameter: real_val ** (1/order).
        self.data = jnp.power(real_val.astype(jnp.float32), 1.0 / order)

    def __call__(self) -> jax.Array:
        # Read `order` at call time (like torch's forward reading self.order),
        # so a mutated order parameter is honored.  This module is not jitted.
        return ordered_param_forward(self.data, float(self.order[0]))


# ---------------------------------------------------------------------------
# Demo / self-test
# ---------------------------------------------------------------------------

if __name__ == "__main__":
    key = jax.random.PRNGKey(0)

    # Small deterministic "real_val" parameter (hidden=32 rows, 128 lanes).
    # Kept strictly positive: real_val ** (1/3) with negative entries would be
    # NaN in the PyTorch init as well, so the positive domain is the valid one.
    M, N = 32, 128
    real_val = jax.random.uniform(key, (M, N), dtype=jnp.float32,
                                  minval=0.1, maxval=2.0)
    order = 3.0
    module = OrderedParam(real_val, order=order)

    # Force the Pallas path at this parameter-sized shape so the kernel runs
    # (the default path would short-circuit to fused plain-JAX pow).
    out = jax.block_until_ready(
        ordered_param_forward(module.data, order, min_pallas_bytes=0))
    ref = jnp.power(module.data, module.order[0])
    assert out.shape == real_val.shape
    assert out.dtype == jnp.float32
    assert jnp.allclose(out, ref, rtol=1e-5, atol=1e-5), "mismatch vs reference"
    # Round-trip sanity: data**order should recover real_val (up to fp error).
    assert jnp.allclose(out, real_val, rtol=1e-3, atol=1e-4), "round-trip mismatch"

    # Default module call: tiny parameters take the fused plain-JAX path.
    out_default = jax.block_until_ready(module())
    assert jnp.allclose(out_default, ref, rtol=1e-5, atol=1e-5)

    # Odd, non-tile-aligned shape (37x96: total not a multiple of 128)
    # exercises the full-extent-block fallback, with a negative integer order.
    real_odd = jax.random.uniform(jax.random.PRNGKey(1), (37, 96),
                                  dtype=jnp.float32, minval=0.1, maxval=2.0)
    mod_odd = OrderedParam(real_odd, order=-3.0)
    out_odd = jax.block_until_ready(
        ordered_param_forward(mod_odd.data, -3.0, min_pallas_bytes=0))
    ref_odd = jnp.power(mod_odd.data, jnp.float32(-3.0))
    assert out_odd.shape == real_odd.shape
    assert jnp.allclose(out_odd, ref_odd, rtol=1e-5, atol=1e-5), "odd-shape mismatch"

    # Non-integer order on a Pallas-sized 1-D parameter: exercises the
    # exp(order*log(x)) EUP path and the >=8-sublane lane-dense packing of
    # vector parameters (384 KiB f32 -> default Pallas path).
    real_vec = jax.random.uniform(jax.random.PRNGKey(2), (96 * 1024,),
                                  dtype=jnp.float32, minval=0.1, maxval=2.0)
    mod_vec = OrderedParam(real_vec, order=2.5)
    out_vec = jax.block_until_ready(mod_vec())
    ref_vec = jnp.power(mod_vec.data, jnp.float32(2.5))
    assert out_vec.shape == real_vec.shape
    assert jnp.allclose(out_vec, ref_vec, rtol=1e-5, atol=1e-6), "non-int order mismatch"

    print("KERNEL_OK")
</pallas_src>

<mosaic_0001>
module attributes {stable_mosaic.version = 11 : i64} {
  func.func @kernel(%arg0: i32, %arg1: i32, %arg2: memref<8x512xf32, #tpu.memory_space<vmem>>, %arg3: memref<8x512xf32, #tpu.memory_space<vmem>>) attributes {dimension_semantics = [#tpu.dimension_semantics<parallel>, #tpu.dimension_semantics<parallel>], iteration_bounds = array<i64: 1, 1>, scalar_prefetch = 0 : i64, scratch_operands = 0 : i64, tpu.core_type = #tpu.core_type<tc>, window_params = [{transform_indices = @transform_0, window_bounds = array<i64: 8, 512>}, {transform_indices = @transform_1, window_bounds = array<i64: 8, 512>}]} {
    %c0 = arith.constant 0 : index
    %c0_0 = arith.constant 0 : index
    %0 = vector.load %arg2[%c0, %c0_0] : memref<8x512xf32, #tpu.memory_space<vmem>>, vector<8x512xf32>
    %1 = arith.mulf %0, %0 : vector<8x512xf32>
    %2 = arith.mulf %0, %1 : vector<8x512xf32>
    %c0_1 = arith.constant 0 : index
    %c0_2 = arith.constant 0 : index
    %3 = vector.load %arg3[%c0_1, %c0_2] : memref<8x512xf32, #tpu.memory_space<vmem>>, vector<8x512xf32>
    tpu.vector_store %arg3[%c0_1, %c0_2], %2 {strides = array<i32>} : memref<8x512xf32, #tpu.memory_space<vmem>>, vector<8x512xf32>,
    return
  }
  func.func @transform_0(%arg0: i32, %arg1: i32) -> (i32, i32) {
    %c0_i32 = arith.constant 0 : i32
    return %arg0, %arg1 : i32, i32
  }
  func.func @transform_1(%arg0: i32, %arg1: i32) -> (i32, i32) {
    %c0_i32 = arith.constant 0 : i32
    return %arg0, %arg1 : i32, i32
  }
}

</mosaic_0001>

<bundles_post_ra>
// kernel: tpu_custom_call.1
= control target key start
LH: loop header
LB: loop body
LE: loop exit
PB: predicated region body
PF: predicated region fallthrough
CT: control target
= control target key end

     0   :  { %6 = vsyncpa [#allocation3], 0  ;;  %s138_s0 = inlined_call_operand.hbm [shape: f32[8,512], index: 0, kind: input, shape index: {}]   ;;  %s139_s1 = inlined_call_operand.hbm [shape: f32[8,512], index: 1, kind: output, shape index: {}]  }
   0x1   :  { %7 = vsyncpa [#allocation4], 0  ;;  %s102_s6 = smov [#allocation2]   ;;  %s54_s10 = scalar_lea.hbm %s138_s0, 512 }
   0x2   :  { %s14_s7 = sshll.u32 %s102_s6, 4  ;;  %p55_p0 = scmp.ne.s32.totalorder %s138_s0, %s54_s10  ;;  %s15_s7 = int_to_ptr.vmem [resolvable:$true] %s14_s7 }
   0x3   :  { %p58_p1 = scmp.lt.u32.totalorder %s54_s10, %s138_s0 }
   0x5   :  { %p60_p2 = pnand %p58_p1, %p55_p0 }
   0x7   :  { %63 = shalt.err (!%p60_p2)
}
   0x8   :  { %s64_s15 = scalar_lea.vmem %s15_s7, 512  ;;  %p69_p4 = scmp.lt.s32.totalorder %s15_s7, %s15_s7 }
   0x9   :  { %p65_p3 = scmp.ne.s32.totalorder %s15_s7, %s64_s15  ;;  %p70_p5 = scmp.lt.s32.totalorder %s64_s15, %s64_s15 }
   0xb   :  { %p71_p6 = por %p70_p5, %p69_p4 }
   0xd   :  { %p72_p7 = pnand %p71_p6, %p65_p3 }
   0xf   :  { %75 = shalt.err (!%p72_p7)
}
  0x10   :  { %17 = dma.hbm_to_vmem [thread:$0]  %s138_s0, 512, %s15_s7, [#allocation3]  }
  0x11   :  { %98 = dma.done.wait [#allocation3], 512  }
  0x12   :  { %99 = vsyncadd [#allocation3], 4294966784  ;;  %v21_v0 = vld [vmem:[#allocation2] sm:$0xff]  ;;  %v22_v1 = vld [vmem:[#allocation2 + $0x8] sm:$0xff]  ;;  %s103_s18 = smov [#allocation5]  }
  0x13   :  { %v23_v2 = vld [vmem:[#allocation2 + $0x10] sm:$0xff]  ;;  %v25_v3 = vmul.f32 %v21_v0, %v21_v0  ;;  %v26_v4 = vmul.f32 %v22_v1, %v22_v1  ;;  %v24_v6 = vld [vmem:[#allocation2 + $0x18] sm:$0xff]  ;;  %s43_s19 = sshll.u32 %s103_s18, 4  ;;  %s44_s19 = int_to_ptr.vmem [resolvable:$true] %s43_s19 }
  0x14   :  { %v27_v5 = vmul.f32 %v23_v2, %v23_v2  ;;  %v28_v7 = vmul.f32 %v24_v6, %v24_v6  ;;  %s76_s0 = scalar_lea.vmem %s44_s19, 512  ;;  %p81_p9 = scmp.lt.s32.totalorder %s44_s19, %s44_s19 }
  0x15   :  { %v29_v8 = vmul.f32 %v25_v3, %v21_v0  ;;  %v30_v9 = vmul.f32 %v26_v4, %v22_v1  ;;  %p77_p8 = scmp.ne.s32.totalorder %s44_s19, %s76_s0  ;;  %p82_p10 = scmp.lt.s32.totalorder %s76_s0, %s76_s0 }
  0x16   :  { %v31_v10 = vmul.f32 %v27_v5, %v23_v2  ;;  %v32_v11 = vmul.f32 %v28_v7, %v24_v6 }
  0x17   :  { %33 = vst [vmem:[#allocation5] sm:$0xff] %v29_v8  ;;  %34 = vst [vmem:[#allocation5 + $0x8] sm:$0xff] %v30_v9  ;;  %p83_p11 = por %p82_p10, %p81_p9 }
  0x18   :  { %35 = vst [vmem:[#allocation5 + $0x10] sm:$0xff] %v31_v10  ;;  %36 = vst [vmem:[#allocation5 + $0x18] sm:$0xff] %v32_v11 }
  0x19   :  { %p84_p12 = pnand %p83_p11, %p77_p8 }
  0x1b   :  { %87 = shalt.err (!%p84_p12)
}
  0x1c   :  { %s88_s22 = scalar_lea.hbm %s139_s1, 512 }
  0x1d   :  { %p89_p13 = scmp.ne.s32.totalorder %s139_s1, %s88_s22  ;;  %p92_p0 = scmp.lt.u32.totalorder %s88_s22, %s139_s1 }
  0x1f   :  { %p94_p1 = pnand %p92_p0, %p89_p13 }
  0x21   :  { %97 = shalt.err (!%p94_p1)
}
  0x22   :  { %46 = dma.vmem_to_hbm [thread:$0]  %s44_s19, 512, %s139_s1, [#allocation4]  }
  0x23   :  { %100 = dma.done.wait [#allocation4], 512  }
  0x24   :  { %101 = vsyncadd [#allocation4], 4294966784 }
  0x25   :  { %50 = vsyncpa [#allocation3], 1 }
  0x26   :  { %51 = vsyncpa [#allocation4], 1 }

</bundles_post_ra>
